<compile_context>
chip_gen: v7x
topology: tpu7x:2x2x1
jax: 0.10.0
libtpu: 0.0.40
codegen_flags: <defaults>
</compile_context>

<pallas_src>
import jax
import jax.numpy as jnp
from jax.experimental import pallas as pl
from jax.experimental.pallas import tpu as pltpu

HIDDEN = 128
OUT = 2
OUT_PAD_SUB = 8  # fc2 outputs padded to 8 sublanes for the transposed store


def _round_up(x, m):
    return (x + m - 1) // m * m


def mlp_kernel(x_ref, w1_ref, b1_ref, w2t_ref, b2t_ref, ot_ref):
    # x arrives as f32 straight from HBM; cast to bf16 on the VPU (hidden
    # under the DMA / MXU) immediately before the fc1 dot.
    x = x_ref[...].astype(w1_ref.dtype)
    h = jnp.dot(x, w1_ref[...], preferred_element_type=jnp.float32)
    h = jnp.maximum(h + b1_ref[...], 0.0)
    # fc2 in transposed form: (8, H) . (tb, H) contracting H -> (8, tb).
    # Batch sits on the lane axis so the store is lane-dense / unmasked.
    out_t = jax.lax.dot_general(
        w2t_ref[...], h.astype(w2t_ref.dtype),
        dimension_numbers=(((1,), (1,)), ((), ())),
        preferred_element_type=jnp.float32)
    ot_ref[...] = (out_t + b2t_ref[...]).astype(ot_ref.dtype)


def net_forward(x, w1, b1, w2, b2, *, block_b=1024, compute_dtype=jnp.bfloat16):
    """fc2(relu(fc1(x))).

    x: (B, E) f32; w1: (E, 128); b1: (128,); w2: (128, 2); b2: (2,) -> (B, 2) f32.
    """
    B, E = x.shape
    H = w1.shape[1]
    O = w2.shape[1]

    # --- small one-time weight prep (tiny vs. the x stream) ------------------
    w1c = w1.astype(compute_dtype)                                  # (E, H)
    b1r = b1.reshape(1, H).astype(jnp.float32)                      # (1, H)
    w2t = (jnp.zeros((OUT_PAD_SUB, H), jnp.float32)
           .at[:O, :].set(w2.T).astype(compute_dtype))              # (8, H)
    b2t = jnp.zeros((OUT_PAD_SUB, 1), jnp.float32).at[:O, 0].set(b2)  # (8, 1)

    # --- batch tile sizing ---------------------------------------------------
    if B <= 128:
        # Single tile; block dims equal the full array dims (always legal).
        tb = B
    else:
        # Multiple of 128 -> lane-dense transposed output store.
        # Keep the double-buffered f32 x tile within a conservative VMEM budget
        # (safe for v7x's 64 MiB VMEM even at large encode_size).
        vmem_cap_rows = max(128, ((8 * 1024 * 1024) // (E * 4)) // 128 * 128)
        tb = min(block_b, vmem_cap_rows)
        # Guarantee >= 2 grid steps so the "parallel" axis can shard across
        # both v7x TensorCores (neutral on v5e/v6e).
        tb = min(tb, _round_up(pl.cdiv(B, 2), 128))
    grid = (pl.cdiv(B, tb),)

    # TODO(synk): for very large encode_size a K/reduction grid axis over E
    # with a VMEM accumulator would be needed; unnecessary at these sizes.
    cost = pl.CostEstimate(
        flops=2 * B * E * H + 2 * B * H * OUT_PAD_SUB,
        transcendentals=0,
        bytes_accessed=int(
            B * E * 4                       # x (f32, read once)
            + E * H * 2 + OUT_PAD_SUB * H * 2   # bf16 weights (resident)
            + H * 4 + OUT_PAD_SUB * 4           # biases
            + OUT_PAD_SUB * B * 4               # transposed f32 output
        ),
    )

    out_t = pl.pallas_call(
        mlp_kernel,
        out_shape=jax.ShapeDtypeStruct((OUT_PAD_SUB, B), jnp.float32),
        grid_spec=pl.GridSpec(
            grid=grid,
            in_specs=[
                pl.BlockSpec((tb, E), lambda i: (i, 0)),            # x: pipelined, f32
                pl.BlockSpec((E, H), lambda i: (0, 0)),             # w1: VMEM-resident
                pl.BlockSpec((1, H), lambda i: (0, 0)),             # b1: VMEM-resident
                pl.BlockSpec((OUT_PAD_SUB, H), lambda i: (0, 0)),   # w2^T (padded): resident
                pl.BlockSpec((OUT_PAD_SUB, 1), lambda i: (0, 0)),   # b2^T (padded): resident
            ],
            out_specs=pl.BlockSpec((OUT_PAD_SUB, tb), lambda i: (0, i)),
        ),
        compiler_params=pltpu.CompilerParams(
            dimension_semantics=("parallel",),   # shard batch tiles across TCs
        ),
        cost_estimate=cost,
    )(x, w1c, b1r, w2t, b2t)

    # Slice the 2 real output rows and transpose back to (B, 2).
    return out_t[:O, :].T


def init_params(key, encode_size, hidden=HIDDEN, out_dim=OUT):
    """Deterministic init mirroring nn.Linear's U(-1/sqrt(fan_in), 1/sqrt(fan_in))."""
    k1, k2, k3, k4 = jax.random.split(key, 4)
    bound1 = 1.0 / jnp.sqrt(encode_size)
    bound2 = 1.0 / jnp.sqrt(hidden)
    w1 = jax.random.uniform(k1, (encode_size, hidden), jnp.float32, -bound1, bound1)
    b1 = jax.random.uniform(k2, (hidden,), jnp.float32, -bound1, bound1)
    w2 = jax.random.uniform(k3, (hidden, out_dim), jnp.float32, -bound2, bound2)
    b2 = jax.random.uniform(k4, (out_dim,), jnp.float32, -bound2, bound2)
    return w1, b1, w2, b2


if __name__ == "__main__":
    key = jax.random.PRNGKey(0)
    kx, kp = jax.random.split(key)

    batch = 8
    encode_size = 32

    x = jax.random.normal(kx, (batch, encode_size), jnp.float32)
    w1, b1, w2, b2 = init_params(kp, encode_size)

    out = jax.block_until_ready(net_forward(x, w1, b1, w2, b2))
    assert out.shape == (batch, 2)

    # Reference mirroring the kernel's bf16-operand / f32-accumulate math.
    # NOTE: bf16 MXU math diverges from PyTorch's pure-f32 forward by ~1e-2
    # relative; pass compute_dtype=jnp.float32 if bit-level parity is needed.
    bf = jnp.bfloat16
    xb = x.astype(bf).astype(jnp.float32)
    w1b = w1.astype(bf).astype(jnp.float32)
    w2b = w2.astype(bf).astype(jnp.float32)
    h = jnp.maximum(xb @ w1b + b1.reshape(1, -1), 0.0)
    hb = h.astype(bf).astype(jnp.float32)
    ref = hb @ w2b + b2.reshape(1, -1)
    assert jnp.allclose(out, ref, atol=1e-2, rtol=1e-2)

    print("KERNEL_OK")
</pallas_src>

<mosaic_0001>
module attributes {stable_mosaic.version = 11 : i64} {
  func.func @mlp_kernel(%arg0: i32, %arg1: memref<8x32xf32, #tpu.memory_space<vmem>>, %arg2: memref<32x128xbf16, #tpu.memory_space<vmem>>, %arg3: memref<1x128xf32, #tpu.memory_space<vmem>>, %arg4: memref<8x128xbf16, #tpu.memory_space<vmem>>, %arg5: memref<8x1xf32, #tpu.memory_space<vmem>>, %arg6: memref<8x8xf32, #tpu.memory_space<vmem>>) attributes {dimension_semantics = [#tpu.dimension_semantics<parallel>], iteration_bounds = array<i64: 1>, scalar_prefetch = 0 : i64, scratch_operands = 0 : i64, tpu.core_type = #tpu.core_type<tc>, window_params = [{transform_indices = @transform_0, window_bounds = array<i64: 8, 32>}, {pipeline_mode = #tpu.pipeline_mode<synchronous>, transform_indices = @transform_1, window_bounds = array<i64: 32, 128>}, {pipeline_mode = #tpu.pipeline_mode<synchronous>, transform_indices = @transform_2, window_bounds = array<i64: 1, 128>}, {pipeline_mode = #tpu.pipeline_mode<synchronous>, transform_indices = @transform_3, window_bounds = array<i64: 8, 128>}, {pipeline_mode = #tpu.pipeline_mode<synchronous>, transform_indices = @transform_4, window_bounds = array<i64: 8, 1>}, {transform_indices = @transform_5, window_bounds = array<i64: 8, 8>}]} {
    %c0 = arith.constant 0 : index
    %c0_0 = arith.constant 0 : index
    %0 = vector.load %arg1[%c0, %c0_0] : memref<8x32xf32, #tpu.memory_space<vmem>>, vector<8x32xf32>
    %1 = arith.truncf %0 : vector<8x32xf32> to vector<8x32xbf16>
    %c0_1 = arith.constant 0 : index
    %c0_2 = arith.constant 0 : index
    %2 = vector.load %arg2[%c0_1, %c0_2] : memref<32x128xbf16, #tpu.memory_space<vmem>>, vector<32x128xbf16>
    %cst = arith.constant dense<0.000000e+00> : vector<8x128xf32>
    %3 = tpu.matmul %1, %2, %cst {dimension_numbers = #tpu.dot_dimension_numbers<[1], [0], [0], [1], [0, 0, 1, 1], [], []>} : vector<8x32xbf16>, vector<32x128xbf16>, vector<8x128xf32> -> vector<8x128xf32>
    %c0_3 = arith.constant 0 : index
    %c0_4 = arith.constant 0 : index
    %4 = vector.load %arg3[%c0_3, %c0_4] : memref<1x128xf32, #tpu.memory_space<vmem>>, vector<1x128xf32>
    %5 = vector.broadcast %4 : vector<1x128xf32> to vector<8x128xf32>
    %6 = arith.addf %3, %5 : vector<8x128xf32>
    %cst_5 = arith.constant 0.000000e+00 : f32
    %7 = vector.broadcast %cst_5 : f32 to vector<8x128xf32>
    %8 = arith.maximumf %6, %7 : vector<8x128xf32>
    %c0_6 = arith.constant 0 : index
    %c0_7 = arith.constant 0 : index
    %9 = vector.load %arg4[%c0_6, %c0_7] : memref<8x128xbf16, #tpu.memory_space<vmem>>, vector<8x128xbf16>
    %10 = arith.truncf %8 : vector<8x128xf32> to vector<8x128xbf16>
    %cst_8 = arith.constant dense<0.000000e+00> : vector<8x8xf32>
    %11 = tpu.matmul %9, %10, %cst_8 {dimension_numbers = #tpu.dot_dimension_numbers<[1], [1], [0], [0], [0, 0, 1, 0], [], []>} : vector<8x128xbf16>, vector<8x128xbf16>, vector<8x8xf32> -> vector<8x8xf32>
    %c0_9 = arith.constant 0 : index
    %c0_10 = arith.constant 0 : index
    %12 = vector.load %arg5[%c0_9, %c0_10] : memref<8x1xf32, #tpu.memory_space<vmem>>, vector<8x1xf32>
    %13 = vector.broadcast %12 : vector<8x1xf32> to vector<8x8xf32>
    %14 = arith.addf %11, %13 : vector<8x8xf32>
    %c0_11 = arith.constant 0 : index
    %c0_12 = arith.constant 0 : index
    %15 = vector.load %arg6[%c0_11, %c0_12] : memref<8x8xf32, #tpu.memory_space<vmem>>, vector<8x8xf32>
    tpu.vector_store %arg6[%c0_11, %c0_12], %14 {strides = array<i32>} : memref<8x8xf32, #tpu.memory_space<vmem>>, vector<8x8xf32>,
    return
  }
  func.func @transform_0(%arg0: i32) -> (i32, i32) {
    %c0_i32 = arith.constant 0 : i32
    %c0_i32_0 = arith.constant 0 : i32
    return %arg0, %c0_i32 : i32, i32
  }
  func.func @transform_1(%arg0: i32) -> (i32, i32) {
    %c0_i32 = arith.constant 0 : i32
    %c0_i32_0 = arith.constant 0 : i32
    %c0_i32_1 = arith.constant 0 : i32
    return %c0_i32, %c0_i32_0 : i32, i32
  }
  func.func @transform_2(%arg0: i32) -> (i32, i32) {
    %c0_i32 = arith.constant 0 : i32
    %c0_i32_0 = arith.constant 0 : i32
    %c0_i32_1 = arith.constant 0 : i32
    return %c0_i32, %c0_i32_0 : i32, i32
  }
  func.func @transform_3(%arg0: i32) -> (i32, i32) {
    %c0_i32 = arith.constant 0 : i32
    %c0_i32_0 = arith.constant 0 : i32
    %c0_i32_1 = arith.constant 0 : i32
    return %c0_i32, %c0_i32_0 : i32, i32
  }
  func.func @transform_4(%arg0: i32) -> (i32, i32) {
    %c0_i32 = arith.constant 0 : i32
    %c0_i32_0 = arith.constant 0 : i32
    %c0_i32_1 = arith.constant 0 : i32
    return %c0_i32, %c0_i32_0 : i32, i32
  }
  func.func @transform_5(%arg0: i32) -> (i32, i32) {
    %c0_i32 = arith.constant 0 : i32
    %c0_i32_0 = arith.constant 0 : i32
    return %c0_i32, %arg0 : i32, i32
  }
}

</mosaic_0001>

<bundles_post_ra>
// kernel: tpu_custom_call.1
= control target key start
LH: loop header
LB: loop body
LE: loop exit
PB: predicated region body
PF: predicated region fallthrough
CT: control target
= control target key end

     0   :  { %10 = vsyncpa [#allocation3], 0  ;;  %s325_s0 = inlined_call_operand.vmem [shape: f32[8,32], index: 0, kind: input, shape index: {}]   ;;  %s326_s1 = inlined_call_operand.hbm [shape: bf16[32,128], index: 1, kind: input, shape index: {}]   ;;  %s327_s2 = inlined_call_operand.vmem [shape: f32[1,128], index: 2, kind: input, shape index: {}]   ;;  %s328_s3 = inlined_call_operand.vmem [shape: bf16[8,128], index: 3, kind: input, shape index: {}]   ;;  %s329_s4 = inlined_call_operand.vmem [shape: f32[8,1], index: 4, kind: input, shape index: {}]   ;;  %s330_s5 = inlined_call_operand.hbm [shape: f32[8,8], index: 5, kind: output, shape index: {}]  }
   0x1   :  { %11 = vsyncpa [#allocation4], 0  ;;  %s252_s18 = smov [#allocation2]   ;;  %s204_s22 = scalar_lea.hbm %s326_s1, 256 }
   0x2   :  { %s19_s19 = sshll.u32 %s252_s18, 4  ;;  %p205_p0 = scmp.ne.s32.totalorder %s326_s1, %s204_s22  ;;  %s20_s19 = int_to_ptr.vmem [resolvable:$true] %s19_s19 }
   0x3   :  { %p208_p1 = scmp.lt.u32.totalorder %s204_s22, %s326_s1 }
   0x5   :  { %p210_p2 = pnand %p208_p1, %p205_p0 }
   0x7   :  { %213 = shalt.err (!%p210_p2)
}
   0x8   :  { %s214_s27 = scalar_lea.vmem %s20_s19, 256  ;;  %p219_p4 = scmp.lt.s32.totalorder %s20_s19, %s20_s19 }
   0x9   :  { %p215_p3 = scmp.ne.s32.totalorder %s20_s19, %s214_s27  ;;  %p220_p5 = scmp.lt.s32.totalorder %s214_s27, %s214_s27 }
   0xb   :  { %p221_p6 = por %p220_p5, %p219_p4 }
   0xd   :  { %p222_p7 = pnand %p221_p6, %p215_p3 }
   0xf   :  { %225 = shalt.err (!%p222_p7)
}
  0x10   :  { %s253_s28 = smov 64   ;;  %s254_s29 = smov 4  }
  0x11   :  { %25 = dma.hbm_to_vmem [thread:$0]  %s326_s1, 256, %s20_s19, [#allocation3], %s253_s28, %s253_s28, %s254_s29  }
  0x12   :  { %248 = dma.done.wait [#allocation3], 256  }
  0x13   :  { %249 = vsyncadd [#allocation3], 4294967040  ;;  %v255_v0 = vmov 0.0   ;;  %vm256_vm0 = vmmov 0   ;;  %v202_v1 = vld [vmem:[#allocation2] sm:$0xff]   ;;  %v203_v2 = vld [vmem:[#allocation2 + $0x8] sm:$0xff]  }
  0x14   :  { %180 = vmatprep.subr.bf16.mxu0 %v255_v0  ;;  %184 = vmatprep.mubr.msk.bf16.mxu0 %vm256_vm0, %v255_v0  ;;  %v36_v3 = vld [vmem:[%s325_s0] sm:$0xff]  ;;  %vm61_vm1 = vcmask 261120   ;;  %v257_v6 = vmov 0   ;;  %vm154_vm2 = vcmask 64512  }
  0x15   :  { %188 = vmatprep.subr.bf16.mxu1 %v255_v0  ;;  %190 = vmatprep.mubr.msk.bf16.mxu1 %vm256_vm0, %v255_v0  ;;  %v37_v4 = vpack.c.bf16 %v36_v3, %v36_v3  ;;  %v108_v5 = vld [vmem:[%s329_s4] sm:$0xff]  ;;  %s258_s4 = smov [#allocation5]  }
  0x16   :  { %181 = vmatpush3.bf16.msra.mxu0 %v202_v1  ;;  %201 = vset.pattern.permute.xlu0 %v257_v6  ;;  %v171_v7 = vld [vmem:[%s327_s2] ss:$0 sm:$0xff]  ;;  %s162_s13 = sshll.u32 %s258_s4, 4  ;;  %s163_s13 = int_to_ptr.vmem [resolvable:$true] %s162_s13 }
  0x17   :  { %182 = vmatprep.subr.bf16.mxu0 %v255_v0  ;;  %111 = vperm.xlu0 %201, %v108_v5   ;;  %v106_v15 = vld [vmem:[%s328_s3] sm:$0xf]  ;;  %s226_s2 = scalar_lea.vmem %s163_s13, 128  ;;  %p231_p9 = scmp.lt.s32.totalorder %s163_s13, %s163_s13 }
  0x18   :  { %p227_p8 = scmp.ne.s32.totalorder %s163_s13, %s226_s2  ;;  %p232_p10 = scmp.lt.s32.totalorder %s226_s2, %s226_s2 }
  0x1a   :  { %183 = vmatpush3.bf16.msra.mxu0 %v203_v2  ;;  %p233_p11 = por %p232_p10, %p231_p9 }
  0x1c   :  { %p234_p12 = pnand %p233_p11, %p227_p8 }
  0x1d   :  { %185 = vmatmul.mubr.msk.bf16.vlgmr.msra.gmra.mrb[0].mxu0 %vm61_vm1, %v37_v4 }
  0x96   :  { %v112_v16 = vpop.permute.xlu0 %111 }
  0xf0   :  { %v99_v8 = vpop.f32.mrb[0].mxu0 }
  0xf1   :  { %v100_v9 = vadd.f32 %v171_v7, %v99_v8  ;;  %v186_v10 = vpop.f32.mrb[1].mxu0 }
  0xf2   :  { %v102_v11 = vpop.f32.mrb[2].mxu0 }
  0xf3   :  { %v105_v12 = vmax.f32 %v100_v9, 0.0  ;;  %v187_v13 = vpop.f32.mrb[3].mxu0 }
  0xf5   :  { %v107_v14 = vpack.c.bf16 %v105_v12, %v105_v12 }
  0xf7   :  { %189 = vmatpush3.bf16.xpose.msra.mxu1 %v107_v14 }
  0xfe   :  { %191 = vmatmul.mubr.bf16.vlgmr.msra.gmra.mrb[0].mxu1 %v106_v15 }
 0x1d1   :  { %v148_v17 = vpop.f32.mrb[0].mxu1 }
 0x1d2   :  { %v149_v18 = vadd.f32 %v148_v17, %v112_v16  ;;  %v192_v19 = vpop.f32.mrb[1].mxu1 }
 0x1d3   :  { %v151_v20 = vpop.f32.mrb[2].mxu1 }
 0x1d4   :  { %v193_v21 = vpop.f32.mrb[3].mxu1  ;;  %155 = vst.msk [vmem:[#allocation5] sm:$0xff] %vm154_vm2, %v149_v18 }
 0x1d5   :  { %237 = shalt.err (!%p234_p12)
}
 0x1d6   :  { %s238_s15 = scalar_lea.hbm %s330_s5, 128 }
 0x1d7   :  { %p239_p13 = scmp.ne.s32.totalorder %s330_s5, %s238_s15  ;;  %p242_p0 = scmp.lt.u32.totalorder %s238_s15, %s330_s5 }
 0x1d9   :  { %p244_p1 = pnand %p242_p0, %p239_p13 }
 0x1db   :  { %247 = shalt.err (!%p244_p1)
}
 0x1dc   :  { %165 = dma.vmem_to_hbm [thread:$0]  %s163_s13, 128, %s330_s5, [#allocation4]  }
 0x1dd   :  { %250 = dma.done.wait [#allocation4], 128  }
 0x1de   :  { %251 = vsyncadd [#allocation4], 4294967168 }
 0x1df   :  { %169 = vsyncpa [#allocation3], 1 }
 0x1e0   :  { %170 = vsyncpa [#allocation4], 1 }

</bundles_post_ra>
